<compile_context>
chip_gen: v5e
topology: v5e:2x2
jax: 0.10.0
libtpu: 0.0.40
codegen_flags: <defaults>
</compile_context>

<pallas_src>
import jax
import jax.numpy as jnp
from jax import lax
from jax.experimental import pallas as pl
from jax.experimental.pallas import tpu as pltpu


def _make_fused_block_kernel(NB, H, WC):
    """Fused conv1+bn1+relu+conv2+bn2+residual+relu for a block of NB images.

    All tensors live in the lane-dense (H, W*C) layout; WC = W * planes.
    Weights m1/m2 are bf16 banded (WC, WC) matrices per kernel row kh with the
    BN scale already folded in; biases are f32.
    """
    f32 = jnp.float32
    bf16 = jnp.bfloat16
    M = NB * H  # matmul M dimension

    def kernel(x_ref, m1_ref, b1_ref, m2_ref, b2_ref, o_ref, xp_ref, hp_ref):
        x = x_ref[...].astype(f32)                       # (NB, H, WC)
        zrow = jnp.zeros((NB, 1, WC), f32)

        # --- conv1 + folded bn1 + ReLU -------------------------------------
        # Halo-pad along H only (the W halo is baked into the banded weights).
        # Only the two halo rows are zeroed; interior rows written once.
        xp_ref[:, 0:1, :] = zrow
        xp_ref[:, H + 1:H + 2, :] = zrow
        xp_ref[:, 1:H + 1, :] = x

        up = xp_ref[:, 0:H, :].astype(bf16).reshape(M, WC)       # row r-1
        mid = x.astype(bf16).reshape(M, WC)                      # row r
        dn = xp_ref[:, 2:H + 2, :].astype(bf16).reshape(M, WC)   # row r+1

        acc = jnp.dot(up, m1_ref[0], preferred_element_type=f32)
        acc += jnp.dot(mid, m1_ref[1], preferred_element_type=f32)
        acc += jnp.dot(dn, m1_ref[2], preferred_element_type=f32)
        h = jnp.maximum(acc + b1_ref[...], 0.0)          # (M, WC) f32, stays in VMEM

        # --- conv2 + folded bn2 + residual + ReLU --------------------------
        hp_ref[:, 0:1, :] = zrow
        hp_ref[:, H + 1:H + 2, :] = zrow
        hp_ref[:, 1:H + 1, :] = h.reshape(NB, H, WC)

        up2 = hp_ref[:, 0:H, :].astype(bf16).reshape(M, WC)
        mid2 = h.astype(bf16)
        dn2 = hp_ref[:, 2:H + 2, :].astype(bf16).reshape(M, WC)

        acc = jnp.dot(up2, m2_ref[0], preferred_element_type=f32)
        acc += jnp.dot(mid2, m2_ref[1], preferred_element_type=f32)
        acc += jnp.dot(dn2, m2_ref[2], preferred_element_type=f32)

        # Re-read the residual instead of holding x live across both convs.
        identity = x_ref[...].astype(f32).reshape(M, WC)
        out = jnp.maximum(acc + b2_ref[...] + identity, 0.0)
        o_ref[...] = out.reshape(NB, H, WC).astype(o_ref.dtype)

    return kernel


def fold_bn(gamma, beta, mean, var, eps=1e-5):
    scale = gamma / jnp.sqrt(var + eps)
    bias = beta - mean * scale
    return scale.astype(jnp.float32), bias.astype(jnp.float32)


def build_banded_weight(w_hwio, scale, W):
    """Fold the BN scale into the conv weights and build, for each kernel row
    kh, a banded (W*Cin, W*Cout) matrix implementing the 3x3 conv (stride 1,
    pad 1) directly on the lane-dense (H, W*C) layout.

    M[kh][j*Cin + ci, w*Cout + co] = w[kh, kw, ci, co] with kw = j - w + 1
    (zero outside the band; the W-edge zero padding is implicit in the band
    being clipped at the matrix edges).
    """
    KH, KW, Cin, Cout = w_hwio.shape
    w = w_hwio.astype(jnp.float32) * scale[None, None, None, :]
    mats = []
    for kh in range(KH):
        m = jnp.zeros((W * Cin, W * Cout), jnp.float32)
        for kw in range(KW):
            band = jnp.eye(W, k=1 - kw, dtype=jnp.float32)   # j == w + kw - 1
            m = m + jnp.kron(band, w[kh, kw])
        mats.append(m)
    return jnp.stack(mats)                                    # (3, W*Cin, W*Cout)


def prepare_block_params(p, W):
    """Build the folded / banded parameters ONCE per set of weights."""
    Cin, planes = p["w1"].shape[2], p["w1"].shape[3]
    assert Cin == planes, "identity residual requires in_planes == planes"
    WC = W * planes
    s1, b1 = fold_bn(p["bn1_gamma"], p["bn1_beta"], p["bn1_mean"], p["bn1_var"])
    s2, b2 = fold_bn(p["bn2_gamma"], p["bn2_beta"], p["bn2_mean"], p["bn2_var"])
    return {
        # bf16 weights: native MXU input dtype, halves weight VMEM/DMA.
        "m1": build_banded_weight(p["w1"], s1, W).astype(jnp.bfloat16),
        "m2": build_banded_weight(p["w2"], s2, W).astype(jnp.bfloat16),
        # biases stay f32 (epilogue is f32).
        "b1": jnp.tile(b1, W).reshape(1, WC),
        "b2": jnp.tile(b2, W).reshape(1, WC),
    }


def basic_block_forward(x_nchw, prep, block_batch=None):
    """BasicBlock(in_planes=planes, stride=1, downsample=None).forward, eval BN."""
    N, C, H, W = x_nchw.shape
    WC = W * C
    assert prep["m1"].shape == (3, WC, WC)
    NB = N if block_batch is None else block_batch   # images per grid step
    assert N % NB == 0

    # NCHW -> NHWC -> lane-dense (N, H, W*C)
    x_f = jnp.transpose(x_nchw, (0, 2, 3, 1)).reshape(N, H, WC)

    kernel = _make_fused_block_kernel(NB, H, WC)

    out_f = pl.pallas_call(
        kernel,
        out_shape=jax.ShapeDtypeStruct((N, H, WC), x_nchw.dtype),
        grid_spec=pltpu.PrefetchScalarGridSpec(
            num_scalar_prefetch=0,
            grid=(N // NB,),
            in_specs=[
                pl.BlockSpec((NB, H, WC), lambda b: (b, 0, 0)),    # x (also residual)
                pl.BlockSpec((3, WC, WC), lambda b: (0, 0, 0)),    # banded w1*s1 (bf16)
                pl.BlockSpec((1, WC), lambda b: (0, 0)),           # bn1 bias (f32)
                pl.BlockSpec((3, WC, WC), lambda b: (0, 0, 0)),    # banded w2*s2 (bf16)
                pl.BlockSpec((1, WC), lambda b: (0, 0)),           # bn2 bias (f32)
            ],
            out_specs=pl.BlockSpec((NB, H, WC), lambda b: (b, 0, 0)),
            scratch_shapes=[
                pltpu.VMEM((NB, H + 2, WC), jnp.float32),   # halo-padded x
                pltpu.VMEM((NB, H + 2, WC), jnp.float32),   # halo-padded h
            ],
        ),
        compiler_params=pltpu.CompilerParams(
            dimension_semantics=("parallel",),
            vmem_limit_bytes=32 * 1024 * 1024),
    )(x_f, prep["m1"], prep["b1"], prep["m2"], prep["b2"])

    # lane-dense -> NHWC -> NCHW
    return jnp.transpose(out_f.reshape(N, H, W, C), (0, 3, 1, 2))


def reference_forward(x_nchw, p):
    """Pure-JAX f32 reference (lax conv) for correctness checking."""
    x = jnp.transpose(x_nchw, (0, 2, 3, 1))

    def conv(y, w):
        return lax.conv_general_dilated(
            y, w, (1, 1), "SAME", dimension_numbers=("NHWC", "HWIO", "NHWC"))

    s1, b1 = fold_bn(p["bn1_gamma"], p["bn1_beta"], p["bn1_mean"], p["bn1_var"])
    s2, b2 = fold_bn(p["bn2_gamma"], p["bn2_beta"], p["bn2_mean"], p["bn2_var"])
    h = jnp.maximum(conv(x, p["w1"]) * s1 + b1, 0.0)
    o = jnp.maximum(conv(h, p["w2"]) * s2 + b2 + x, 0.0)
    return jnp.transpose(o, (0, 3, 1, 2))


if __name__ == "__main__":
    N, C, H, W = 2, 8, 16, 16          # in_planes = planes = 8, stride = 1
    planes = C
    key = jax.random.PRNGKey(0)
    ks = jax.random.split(key, 11)

    x = jax.random.normal(ks[0], (N, C, H, W), jnp.float32)
    params = {
        "w1": jax.random.normal(ks[1], (3, 3, C, planes), jnp.float32) * 0.1,
        "bn1_gamma": jax.random.uniform(ks[2], (planes,), minval=0.5, maxval=1.5),
        "bn1_beta": jax.random.normal(ks[3], (planes,)) * 0.1,
        "bn1_mean": jax.random.normal(ks[4], (planes,)) * 0.1,
        "bn1_var": jax.random.uniform(ks[5], (planes,), minval=0.5, maxval=1.5),
        "w2": jax.random.normal(ks[6], (3, 3, planes, planes), jnp.float32) * 0.1,
        "bn2_gamma": jax.random.uniform(ks[7], (planes,), minval=0.5, maxval=1.5),
        "bn2_beta": jax.random.normal(ks[8], (planes,)) * 0.1,
        "bn2_mean": jax.random.normal(ks[9], (planes,)) * 0.1,
        "bn2_var": jax.random.uniform(ks[10], (planes,), minval=0.5, maxval=1.5),
    }

    # Folded / banded weights are built once, outside the forward pass.
    prep = prepare_block_params(params, W)

    out = jax.block_until_ready(basic_block_forward(x, prep))
    ref = reference_forward(x, params)
    assert out.shape == (N, planes, H, W)
    # bf16 MXU operands vs. the f32 reference -> loosened tolerance.
    assert jnp.allclose(out, ref, atol=7.5e-2, rtol=7.5e-2), "mismatch vs reference"
    print("KERNEL_OK")
</pallas_src>

<mosaic_0001>
module attributes {stable_mosaic.version = 11 : i64} {
  func.func @kernel(%arg0: i32, %arg1: memref<2x16x128xf32, #tpu.memory_space<vmem>>, %arg2: memref<3x128x128xbf16, #tpu.memory_space<vmem>>, %arg3: memref<1x128xf32, #tpu.memory_space<vmem>>, %arg4: memref<3x128x128xbf16, #tpu.memory_space<vmem>>, %arg5: memref<1x128xf32, #tpu.memory_space<vmem>>, %arg6: memref<2x16x128xf32, #tpu.memory_space<vmem>>, %arg7: memref<2x18x128xf32, #tpu.memory_space<vmem>>, %arg8: memref<2x18x128xf32, #tpu.memory_space<vmem>>) attributes {dimension_semantics = [#tpu.dimension_semantics<parallel>], iteration_bounds = array<i64: 1>, scalar_prefetch = 0 : i64, scratch_operands = 2 : i64, tpu.core_type = #tpu.core_type<tc>, window_params = [{transform_indices = @transform_0, window_bounds = array<i64: 2, 16, 128>}, {pipeline_mode = #tpu.pipeline_mode<synchronous>, transform_indices = @transform_1, window_bounds = array<i64: 3, 128, 128>}, {pipeline_mode = #tpu.pipeline_mode<synchronous>, transform_indices = @transform_2, window_bounds = array<i64: 1, 128>}, {pipeline_mode = #tpu.pipeline_mode<synchronous>, transform_indices = @transform_3, window_bounds = array<i64: 3, 128, 128>}, {pipeline_mode = #tpu.pipeline_mode<synchronous>, transform_indices = @transform_4, window_bounds = array<i64: 1, 128>}, {transform_indices = @transform_5, window_bounds = array<i64: 2, 16, 128>}]} {
    %c0 = arith.constant 0 : index
    %c0_0 = arith.constant 0 : index
    %c0_1 = arith.constant 0 : index
    %0 = vector.load %arg1[%c0, %c0_0, %c0_1] : memref<2x16x128xf32, #tpu.memory_space<vmem>>, vector<2x16x128xf32>
    %cst = arith.constant 0.000000e+00 : f32
    %1 = vector.broadcast %cst : f32 to vector<2x1x128xf32>
    %c0_2 = arith.constant 0 : index
    %c0_3 = arith.constant 0 : index
    %c0_4 = arith.constant 0 : index
    %2 = vector.load %arg7[%c0_2, %c0_3, %c0_4] : memref<2x18x128xf32, #tpu.memory_space<vmem>>, vector<2x1x128xf32>
    tpu.vector_store %arg7[%c0_2, %c0_3, %c0_4], %1 {strides = array<i32>} : memref<2x18x128xf32, #tpu.memory_space<vmem>>, vector<2x1x128xf32>,
    %c0_5 = arith.constant 0 : index
    %c17 = arith.constant 17 : index
    %c0_6 = arith.constant 0 : index
    %3 = vector.load %arg7[%c0_5, %c17, %c0_6] : memref<2x18x128xf32, #tpu.memory_space<vmem>>, vector<2x1x128xf32>
    tpu.vector_store %arg7[%c0_5, %c17, %c0_6], %1 {strides = array<i32>} : memref<2x18x128xf32, #tpu.memory_space<vmem>>, vector<2x1x128xf32>,
    %c0_7 = arith.constant 0 : index
    %c1 = arith.constant 1 : index
    %c0_8 = arith.constant 0 : index
    %4 = vector.load %arg7[%c0_7, %c1, %c0_8] : memref<2x18x128xf32, #tpu.memory_space<vmem>>, vector<2x16x128xf32>
    tpu.vector_store %arg7[%c0_7, %c1, %c0_8], %0 {strides = array<i32>} : memref<2x18x128xf32, #tpu.memory_space<vmem>>, vector<2x16x128xf32>,
    %c0_9 = arith.constant 0 : index
    %c0_10 = arith.constant 0 : index
    %c0_11 = arith.constant 0 : index
    %5 = vector.load %arg7[%c0_9, %c0_10, %c0_11] : memref<2x18x128xf32, #tpu.memory_space<vmem>>, vector<2x16x128xf32>
    %6 = arith.truncf %5 : vector<2x16x128xf32> to vector<2x16x128xbf16>
    %7 = vector.shape_cast %6 : vector<2x16x128xbf16> to vector<32x128xbf16>
    %8 = arith.truncf %0 : vector<2x16x128xf32> to vector<2x16x128xbf16>
    %9 = vector.shape_cast %8 : vector<2x16x128xbf16> to vector<32x128xbf16>
    %c0_12 = arith.constant 0 : index
    %c2 = arith.constant 2 : index
    %c0_13 = arith.constant 0 : index
    %10 = vector.load %arg7[%c0_12, %c2, %c0_13] : memref<2x18x128xf32, #tpu.memory_space<vmem>>, vector<2x16x128xf32>
    %11 = arith.truncf %10 : vector<2x16x128xf32> to vector<2x16x128xbf16>
    %12 = vector.shape_cast %11 : vector<2x16x128xbf16> to vector<32x128xbf16>
    %c0_14 = arith.constant 0 : index
    %c0_15 = arith.constant 0 : index
    %c0_16 = arith.constant 0 : index
    %13 = vector.load %arg2[%c0_14, %c0_15, %c0_16] : memref<3x128x128xbf16, #tpu.memory_space<vmem>>, vector<1x128x128xbf16>
    %14 = vector.shape_cast %13 : vector<1x128x128xbf16> to vector<128x128xbf16>
    %cst_17 = arith.constant dense<0.000000e+00> : vector<32x128xf32>
    %15 = tpu.matmul %7, %14, %cst_17 {dimension_numbers = #tpu.dot_dimension_numbers<[1], [0], [0], [1], [0, 0, 1, 1], [], []>} : vector<32x128xbf16>, vector<128x128xbf16>, vector<32x128xf32> -> vector<32x128xf32>
    %c1_18 = arith.constant 1 : index
    %c0_19 = arith.constant 0 : index
    %c0_20 = arith.constant 0 : index
    %16 = vector.load %arg2[%c1_18, %c0_19, %c0_20] : memref<3x128x128xbf16, #tpu.memory_space<vmem>>, vector<1x128x128xbf16>
    %17 = vector.shape_cast %16 : vector<1x128x128xbf16> to vector<128x128xbf16>
    %cst_21 = arith.constant dense<0.000000e+00> : vector<32x128xf32>
    %18 = tpu.matmul %9, %17, %cst_21 {dimension_numbers = #tpu.dot_dimension_numbers<[1], [0], [0], [1], [0, 0, 1, 1], [], []>} : vector<32x128xbf16>, vector<128x128xbf16>, vector<32x128xf32> -> vector<32x128xf32>
    %19 = arith.addf %15, %18 : vector<32x128xf32>
    %c2_22 = arith.constant 2 : index
    %c0_23 = arith.constant 0 : index
    %c0_24 = arith.constant 0 : index
    %20 = vector.load %arg2[%c2_22, %c0_23, %c0_24] : memref<3x128x128xbf16, #tpu.memory_space<vmem>>, vector<1x128x128xbf16>
    %21 = vector.shape_cast %20 : vector<1x128x128xbf16> to vector<128x128xbf16>
    %cst_25 = arith.constant dense<0.000000e+00> : vector<32x128xf32>
    %22 = tpu.matmul %12, %21, %cst_25 {dimension_numbers = #tpu.dot_dimension_numbers<[1], [0], [0], [1], [0, 0, 1, 1], [], []>} : vector<32x128xbf16>, vector<128x128xbf16>, vector<32x128xf32> -> vector<32x128xf32>
    %23 = arith.addf %19, %22 : vector<32x128xf32>
    %c0_26 = arith.constant 0 : index
    %c0_27 = arith.constant 0 : index
    %24 = vector.load %arg3[%c0_26, %c0_27] : memref<1x128xf32, #tpu.memory_space<vmem>>, vector<1x128xf32>
    %25 = vector.broadcast %24 : vector<1x128xf32> to vector<32x128xf32>
    %26 = arith.addf %23, %25 : vector<32x128xf32>
    %cst_28 = arith.constant 0.000000e+00 : f32
    %27 = vector.broadcast %cst_28 : f32 to vector<32x128xf32>
    %28 = arith.maximumf %26, %27 : vector<32x128xf32>
    %c0_29 = arith.constant 0 : index
    %c0_30 = arith.constant 0 : index
    %c0_31 = arith.constant 0 : index
    %29 = vector.load %arg8[%c0_29, %c0_30, %c0_31] : memref<2x18x128xf32, #tpu.memory_space<vmem>>, vector<2x1x128xf32>
    tpu.vector_store %arg8[%c0_29, %c0_30, %c0_31], %1 {strides = array<i32>} : memref<2x18x128xf32, #tpu.memory_space<vmem>>, vector<2x1x128xf32>,
    %c0_32 = arith.constant 0 : index
    %c17_33 = arith.constant 17 : index
    %c0_34 = arith.constant 0 : index
    %30 = vector.load %arg8[%c0_32, %c17_33, %c0_34] : memref<2x18x128xf32, #tpu.memory_space<vmem>>, vector<2x1x128xf32>
    tpu.vector_store %arg8[%c0_32, %c17_33, %c0_34], %1 {strides = array<i32>} : memref<2x18x128xf32, #tpu.memory_space<vmem>>, vector<2x1x128xf32>,
    %31 = vector.shape_cast %28 : vector<32x128xf32> to vector<2x16x128xf32>
    %c0_35 = arith.constant 0 : index
    %c1_36 = arith.constant 1 : index
    %c0_37 = arith.constant 0 : index
    %32 = vector.load %arg8[%c0_35, %c1_36, %c0_37] : memref<2x18x128xf32, #tpu.memory_space<vmem>>, vector<2x16x128xf32>
    tpu.vector_store %arg8[%c0_35, %c1_36, %c0_37], %31 {strides = array<i32>} : memref<2x18x128xf32, #tpu.memory_space<vmem>>, vector<2x16x128xf32>,
    %c0_38 = arith.constant 0 : index
    %c0_39 = arith.constant 0 : index
    %c0_40 = arith.constant 0 : index
    %33 = vector.load %arg8[%c0_38, %c0_39, %c0_40] : memref<2x18x128xf32, #tpu.memory_space<vmem>>, vector<2x16x128xf32>
    %34 = arith.truncf %33 : vector<2x16x128xf32> to vector<2x16x128xbf16>
    %35 = vector.shape_cast %34 : vector<2x16x128xbf16> to vector<32x128xbf16>
    %36 = arith.truncf %28 : vector<32x128xf32> to vector<32x128xbf16>
    %c0_41 = arith.constant 0 : index
    %c2_42 = arith.constant 2 : index
    %c0_43 = arith.constant 0 : index
    %37 = vector.load %arg8[%c0_41, %c2_42, %c0_43] : memref<2x18x128xf32, #tpu.memory_space<vmem>>, vector<2x16x128xf32>
    %38 = arith.truncf %37 : vector<2x16x128xf32> to vector<2x16x128xbf16>
    %39 = vector.shape_cast %38 : vector<2x16x128xbf16> to vector<32x128xbf16>
    %c0_44 = arith.constant 0 : index
    %c0_45 = arith.constant 0 : index
    %c0_46 = arith.constant 0 : index
    %40 = vector.load %arg4[%c0_44, %c0_45, %c0_46] : memref<3x128x128xbf16, #tpu.memory_space<vmem>>, vector<1x128x128xbf16>
    %41 = vector.shape_cast %40 : vector<1x128x128xbf16> to vector<128x128xbf16>
    %cst_47 = arith.constant dense<0.000000e+00> : vector<32x128xf32>
    %42 = tpu.matmul %35, %41, %cst_47 {dimension_numbers = #tpu.dot_dimension_numbers<[1], [0], [0], [1], [0, 0, 1, 1], [], []>} : vector<32x128xbf16>, vector<128x128xbf16>, vector<32x128xf32> -> vector<32x128xf32>
    %c1_48 = arith.constant 1 : index
    %c0_49 = arith.constant 0 : index
    %c0_50 = arith.constant 0 : index
    %43 = vector.load %arg4[%c1_48, %c0_49, %c0_50] : memref<3x128x128xbf16, #tpu.memory_space<vmem>>, vector<1x128x128xbf16>
    %44 = vector.shape_cast %43 : vector<1x128x128xbf16> to vector<128x128xbf16>
    %cst_51 = arith.constant dense<0.000000e+00> : vector<32x128xf32>
    %45 = tpu.matmul %36, %44, %cst_51 {dimension_numbers = #tpu.dot_dimension_numbers<[1], [0], [0], [1], [0, 0, 1, 1], [], []>} : vector<32x128xbf16>, vector<128x128xbf16>, vector<32x128xf32> -> vector<32x128xf32>
    %46 = arith.addf %42, %45 : vector<32x128xf32>
    %c2_52 = arith.constant 2 : index
    %c0_53 = arith.constant 0 : index
    %c0_54 = arith.constant 0 : index
    %47 = vector.load %arg4[%c2_52, %c0_53, %c0_54] : memref<3x128x128xbf16, #tpu.memory_space<vmem>>, vector<1x128x128xbf16>
    %48 = vector.shape_cast %47 : vector<1x128x128xbf16> to vector<128x128xbf16>
    %cst_55 = arith.constant dense<0.000000e+00> : vector<32x128xf32>
    %49 = tpu.matmul %39, %48, %cst_55 {dimension_numbers = #tpu.dot_dimension_numbers<[1], [0], [0], [1], [0, 0, 1, 1], [], []>} : vector<32x128xbf16>, vector<128x128xbf16>, vector<32x128xf32> -> vector<32x128xf32>
    %50 = arith.addf %46, %49 : vector<32x128xf32>
    %c0_56 = arith.constant 0 : index
    %c0_57 = arith.constant 0 : index
    %c0_58 = arith.constant 0 : index
    %51 = vector.load %arg1[%c0_56, %c0_57, %c0_58] : memref<2x16x128xf32, #tpu.memory_space<vmem>>, vector<2x16x128xf32>
    %52 = vector.shape_cast %51 : vector<2x16x128xf32> to vector<32x128xf32>
    %c0_59 = arith.constant 0 : index
    %c0_60 = arith.constant 0 : index
    %53 = vector.load %arg5[%c0_59, %c0_60] : memref<1x128xf32, #tpu.memory_space<vmem>>, vector<1x128xf32>
    %54 = vector.broadcast %53 : vector<1x128xf32> to vector<32x128xf32>
    %55 = arith.addf %50, %54 : vector<32x128xf32>
    %56 = arith.addf %55, %52 : vector<32x128xf32>
    %cst_61 = arith.constant 0.000000e+00 : f32
    %57 = vector.broadcast %cst_61 : f32 to vector<32x128xf32>
    %58 = arith.maximumf %56, %57 : vector<32x128xf32>
    %59 = vector.shape_cast %58 : vector<32x128xf32> to vector<2x16x128xf32>
    %c0_62 = arith.constant 0 : index
    %c0_63 = arith.constant 0 : index
    %c0_64 = arith.constant 0 : index
    %60 = vector.load %arg6[%c0_62, %c0_63, %c0_64] : memref<2x16x128xf32, #tpu.memory_space<vmem>>, vector<2x16x128xf32>
    tpu.vector_store %arg6[%c0_62, %c0_63, %c0_64], %59 {strides = array<i32>} : memref<2x16x128xf32, #tpu.memory_space<vmem>>, vector<2x16x128xf32>,
    return
  }
  func.func @transform_0(%arg0: i32) -> (i32, i32, i32) {
    %c0_i32 = arith.constant 0 : i32
    %c0_i32_0 = arith.constant 0 : i32
    %c0_i32_1 = arith.constant 0 : i32
    return %arg0, %c0_i32, %c0_i32_0 : i32, i32, i32
  }
  func.func @transform_1(%arg0: i32) -> (i32, i32, i32) {
    %c0_i32 = arith.constant 0 : i32
    %c0_i32_0 = arith.constant 0 : i32
    %c0_i32_1 = arith.constant 0 : i32
    %c0_i32_2 = arith.constant 0 : i32
    return %c0_i32, %c0_i32_0, %c0_i32_1 : i32, i32, i32
  }
  func.func @transform_2(%arg0: i32) -> (i32, i32) {
    %c0_i32 = arith.constant 0 : i32
    %c0_i32_0 = arith.constant 0 : i32
    %c0_i32_1 = arith.constant 0 : i32
    return %c0_i32, %c0_i32_0 : i32, i32
  }
  func.func @transform_3(%arg0: i32) -> (i32, i32, i32) {
    %c0_i32 = arith.constant 0 : i32
    %c0_i32_0 = arith.constant 0 : i32
    %c0_i32_1 = arith.constant 0 : i32
    %c0_i32_2 = arith.constant 0 : i32
    return %c0_i32, %c0_i32_0, %c0_i32_1 : i32, i32, i32
  }
  func.func @transform_4(%arg0: i32) -> (i32, i32) {
    %c0_i32 = arith.constant 0 : i32
    %c0_i32_0 = arith.constant 0 : i32
    %c0_i32_1 = arith.constant 0 : i32
    return %c0_i32, %c0_i32_0 : i32, i32
  }
  func.func @transform_5(%arg0: i32) -> (i32, i32, i32) {
    %c0_i32 = arith.constant 0 : i32
    %c0_i32_0 = arith.constant 0 : i32
    %c0_i32_1 = arith.constant 0 : i32
    return %arg0, %c0_i32, %c0_i32_0 : i32, i32, i32
  }
}

</mosaic_0001>

<bundles_post_ra>
// kernel: tpu_custom_call.1
= control target key start
LH: loop header
LB: loop body
LE: loop exit
PB: predicated region body
PF: predicated region fallthrough
CT: control target
= control target key end

     0   :  { %10 = vsyncpa [#allocation5], 0  ;;  %s1208_s0 = inlined_call_operand.hbm [shape: f32[2,16,128], index: 0, kind: input, shape index: {}]   ;;  %s1209_s1 = inlined_call_operand.hbm [shape: bf16[3,128,128], index: 1, kind: input, shape index: {}]   ;;  %s1210_s2 = inlined_call_operand.vmem [shape: f32[1,128], index: 2, kind: input, shape index: {}]   ;;  %s1211_s3 = inlined_call_operand.hbm [shape: bf16[3,128,128], index: 3, kind: input, shape index: {}]   ;;  %s1212_s4 = inlined_call_operand.vmem [shape: f32[1,128], index: 4, kind: input, shape index: {}]   ;;  %s1213_s5 = inlined_call_operand.hbm [shape: f32[2,16,128], index: 5, kind: output, shape index: {}]  }
   0x1   :  { %11 = vsyncpa [#allocation8], 0  ;;  %s30_s20 = sshll.u32 %s1209_s1, 4  ;;  %s31_s20 = int_to_ptr.hbm [resolvable:$true] %s30_s20 }
   0x2   :  { %12 = vsyncpa [#allocation6], 0  ;;  %s1121_s21 = smov [#allocation7]   ;;  %s17_s25 = sshll.u32 %s1208_s0, 4  ;;  %s18_s25 = int_to_ptr.hbm [resolvable:$true] %s17_s25 }
   0x3   :  { %s32_s22 = sshll.u32 %s1121_s21, 4  ;;  %s1122_s26 = smov 64   ;;  %s33_s22 = int_to_ptr.vmem [resolvable:$true] %s32_s22 }
   0x4   :  { %s1123_s27 = smov 4   ;;  %s1124_s28 = smov [#allocation4]  }
   0x5   :  { %38 = dma.hbm_to_vmem [thread:$0]  %s31_s20, 3072, %s33_s22, [#allocation8], %s1122_s26, %s1122_s26, %s1123_s27  }
   0x6   :  { %s19_s29 = sshll.u32 %s1124_s28, 4  ;;  %s1125_s30 = smov 128   ;;  %s20_s29 = int_to_ptr.vmem [resolvable:$true] %s19_s29 }
   0x7   :  { %s1126_s6 = smov 8   ;;  %s45_s8 = sshll.u32 %s1211_s3, 4  ;;  %s46_s8 = int_to_ptr.hbm [resolvable:$true] %s45_s8 }
   0x8   :  { %25 = dma.hbm_to_vmem [thread:$0]  %s18_s25, 512, %s20_s29, [#allocation5], %s1125_s30, %s1125_s30, %s1126_s6  }
   0x9   :  { %s1127_s9 = smov [#allocation9]  }
   0xa   :  { %s47_s0 = sshll.u32 %s1127_s9, 4  ;;  %s48_s0 = int_to_ptr.vmem [resolvable:$true] %s47_s0 }
   0xb   :  { %53 = dma.hbm_to_vmem [thread:$0]  %s46_s8, 3072, %s48_s0, [#allocation8], %s1122_s26, %s1122_s26, %s1123_s27  }
   0xc   :  { %1115 = dma.done.wait [#allocation5], 512  }
   0xd   :  { %1116 = vsyncadd [#allocation5], 4294966784 }
   0xe   :  { %1117 = dma.done.wait [#allocation8], 6144  }
   0xf   :  { %1118 = vsyncadd [#allocation8], 4294961152  ;;  %v1128_v0 = vmov 0.0   ;;  %v959_v1 = vld [vmem:[#allocation7 + $0x78] sm:$0xff]  ;;  %v958_v4 = vld [vmem:[#allocation7 + $0x70] sm:$0xff]  ;;  %s738_s15 = sshll.u32 %s1213_s5, 4  ;;  %s739_s15 = int_to_ptr.hbm [resolvable:$true] %s738_s15 }
  0x10   :  { %72 = vst [vmem:[#allocation2] sm:$0x1] %v1128_v0  ;;  %v951_v2 = vld [vmem:[#allocation7 + $0x38] sm:$0xff]  ;;  %193 = vmatpush.bf16.msra.mxu0 %v959_v1  ;;  %v950_v5 = vld [vmem:[#allocation7 + $0x30] sm:$0xff]  ;;  %v957_v7 = vld [vmem:[#allocation7 + $0x68] sm:$0xff] }
  0x11   :  { %73 = vst [vmem:[#allocation2 + $0x18] sm:$0x1] %v1128_v0  ;;  %v967_v3 = vld [vmem:[#allocation7 + $0xb8] sm:$0xff]  ;;  %272 = vmatpush.bf16.msra.mxu1 %v951_v2  ;;  %v966_v6 = vld [vmem:[#allocation7 + $0xb0] sm:$0xff]  ;;  %v949_v8 = vld [vmem:[#allocation7 + $0x28] sm:$0xff] }
  0x12   :  { %74 = vst [vmem:[#allocation2 + $0x11] sm:$0x1] %v1128_v0  ;;  %368 = vmatpush.bf16.msra.mxu2 %v967_v3  ;;  %v965_v9 = vld [vmem:[#allocation7 + $0xa8] sm:$0xff]  ;;  %v1172_v10 = vld [vmem:[#allocation4] sm:$0xff]  ;;  %v1176_v12 = vld [vmem:[#allocation4 + $0x10] sm:$0xff] }
  0x13   :  { %75 = vst [vmem:[#allocation2 + $0x29] sm:$0x1] %v1128_v0  ;;  %v1174_v11 = vld [vmem:[#allocation4 + $0x8] sm:$0xff]  ;;  %v1179_v13 = vld [vmem:[#allocation4 + $0x18] sm:$0xff]  ;;  %v956_v14 = vld [vmem:[#allocation7 + $0x60] sm:$0xff]  ;;  %v88_v29 = vpack.c.bf16 %v1172_v10, %v1172_v10  ;;  %v90_v54 = vpack.c.bf16 %v1176_v12, %v1176_v12 }
  0x14   :  { %403 = vst [vmem:[#allocation3] sm:$0x1] %v1128_v0  ;;  %194 = vmatpush.bf16.msra.mxu0 %v958_v4  ;;  %v948_v15 = vld [vmem:[#allocation7 + $0x20] sm:$0xff]  ;;  %v955_v17 = vld [vmem:[#allocation7 + $0x58] sm:$0xff]  ;;  %v954_v20 = vld [vmem:[#allocation7 + $0x50] sm:$0xff]  ;;  %v89_v30 = vpack.c.bf16 %v1174_v11, %v1174_v11  ;;  %v91_v55 = vpack.c.bf16 %v1179_v13, %v1179_v13 }
  0x15   :  { %404 = vst [vmem:[#allocation3 + $0x18] sm:$0x1] %v1128_v0  ;;  %273 = vmatpush.bf16.msra.mxu1 %v950_v5  ;;  %v964_v16 = vld [vmem:[#allocation7 + $0xa0] sm:$0xff]  ;;  %v947_v18 = vld [vmem:[#allocation7 + $0x18] sm:$0xff]  ;;  %v946_v21 = vld [vmem:[#allocation7 + $0x10] sm:$0xff]  ;;  %v137_v38 = vunpack.c.l.b16 %v88_v29  ;;  %v139_v60 = vunpack.c.l.b16 %v90_v54 }
  0x16   :  { %405 = vst [vmem:[#allocation3 + $0x11] sm:$0x1] %v1128_v0  ;;  %369 = vmatpush.bf16.msra.mxu2 %v966_v6  ;;  %v963_v19 = vld [vmem:[#allocation7 + $0x98] sm:$0xff]  ;;  %v962_v25 = vld [vmem:[#allocation7 + $0x90] sm:$0xff]  ;;  %v953_v33 = vld [vmem:[#allocation7 + $0x48] sm:$0xff]  ;;  %v138_v39 = vunpack.c.l.b16 %v89_v30  ;;  %v140_v61 = vunpack.c.l.b16 %v91_v55 }
  0x17   :  { %406 = vst [vmem:[#allocation3 + $0x29] sm:$0x1] %v1128_v0  ;;  %v983_v24 = vld [vmem:[#allocation9 + $0x78] sm:$0xff]  ;;  %v982_v28 = vld [vmem:[#allocation9 + $0x70] sm:$0xff]  ;;  %v945_v34 = vld [vmem:[#allocation7 + $0x8] sm:$0xff] }
  0x18   :  { %76 = vst [vmem:[#allocation2 + $0x1] sm:$0xff] %v1172_v10  ;;  %195 = vmatpush.bf16.msra.mxu0 %v957_v7  ;;  %510 = vmatpush.bf16.msra.mxu3 %v983_v24  ;;  %v961_v37 = vld [vmem:[#allocation7 + $0x88] sm:$0xff]  ;;  %v952_v42 = vld [vmem:[#allocation7 + $0x40] sm:$0xff]  ;;  %v141_v47 = vpack.c.b16 %v138_v39, %v137_v38  ;;  %v142_v2 = vpack.c.b16 %v140_v61, %v139_v60  ;;  %v975_v7 = vld [vmem:[#allocation9 + $0x38] sm:$0xff] }
  0x19   :  { %274 = vmatpush.bf16.msra.mxu1 %v949_v8  ;;  %77 = vst [vmem:[#allocation2 + $0x9] sm:$0xff] %v1174_v11  ;;  %v944_v43 = vld [vmem:[#allocation7] sm:$0xff]  ;;  %v981_v5 = vld [vmem:[#allocation9 + $0x68] sm:$0xff]  ;;  %v991_v8 = vld [vmem:[#allocation9 + $0xb8] sm:$0xff] }
  0x1a   :  { %370 = vmatpush.bf16.msra.mxu2 %v965_v9  ;;  %78 = vst [vmem:[#allocation2 + $0x19] sm:$0xff] %v1176_v12  ;;  %v960_v46 = vld [vmem:[#allocation7 + $0x80] sm:$0xff]  ;;  %v979_v9 = vld [vmem:[#allocation9 + $0x58] sm:$0xff] }
  0x1b   :  { %79 = vst [vmem:[#allocation2 + $0x21] sm:$0xff] %v1179_v13  ;;  %v980_v6 = vld [vmem:[#allocation9 + $0x60] sm:$0xff]  ;;  %v987_v24 = vld [vmem:[#allocation9 + $0x98] sm:$0xff] }
  0x1c   :  { %196 = vmatpush.bf16.msra.mxu0 %v956_v14  ;;  %511 = vmatpush.bf16.msra.mxu3 %v982_v28  ;;  %v974_v14 = vld [vmem:[#allocation9 + $0x30] sm:$0xff]  ;;  %v985_v28 = vld [vmem:[#allocation9 + $0x88] sm:$0xff]  ;;  %v968_v29 = vld [vmem:[#allocation9] sm:$0xff] }
  0x1d   :  { %275 = vmatpush.bf16.msra.mxu1 %v948_v15  ;;  %v990_v15 = vld [vmem:[#allocation9 + $0xb0] sm:$0xff]  ;;  %v984_v30 = vld [vmem:[#allocation9 + $0x80] sm:$0xff] }
  0x1e   :  { %371 = vmatpush.bf16.msra.mxu2 %v964_v16  ;;  %v978_v16 = vld [vmem:[#allocation9 + $0x50] sm:$0xff] }
  0x1f   :  { %v80_v22 = vld [vmem:[#allocation2] sm:$0xff] }
  0x20   :  { %197 = vmatpush.bf16.msra.mxu0 %v955_v17  ;;  %v81_v23 = vld [vmem:[#allocation2 + $0x8] sm:$0xff]  ;;  %v84_v31 = vpack.c.bf16 %v80_v22, %v80_v22  ;;  %512 = vmatpush.bf16.msra.mxu3 %v981_v5  ;;  %v976_v22 = vld [vmem:[#allocation9 + $0x40] sm:$0xff] }
  0x21   :  { %276 = vmatpush.bf16.msra.mxu1 %v947_v18  ;;  %v92_v26 = vld [vmem:[#allocation2 + $0x2] sm:$0xff]  ;;  %v93_v27 = vld [vmem:[#allocation2 + $0xa] sm:$0xff]  ;;  %v85_v32 = vpack.c.bf16 %v81_v23, %v81_v23  ;;  %v82_v50 = vld [vmem:[#allocation2 + $0x18] sm:$0xff] }
  0x22   :  { %372 = vmatpush.bf16.msra.mxu2 %v963_v19  ;;  %v96_v35 = vpack.c.bf16 %v92_v26, %v92_v26  ;;  %v97_v36 = vpack.c.bf16 %v93_v27, %v93_v27  ;;  %v216_v40 = vunpack.c.l.b16 %v84_v31  ;;  %v83_v51 = vld [vmem:[#allocation2 + $0x20] sm:$0xff]  ;;  %v86_v56 = vpack.c.bf16 %v82_v50, %v82_v50  ;;  %v973_v17 = vld [vmem:[#allocation9 + $0x28] sm:$0xff]  ;;  %v971_v23 = vld [vmem:[#allocation9 + $0x18] sm:$0xff] }
  0x23   :  { %v217_v41 = vunpack.c.l.b16 %v85_v32  ;;  %v94_v52 = vld [vmem:[#allocation2 + $0x1a] sm:$0xff]  ;;  %v95_v53 = vld [vmem:[#allocation2 + $0x22] sm:$0xff]  ;;  %v87_v57 = vpack.c.bf16 %v83_v51, %v83_v51  ;;  %v986_v26 = vld [vmem:[#allocation9 + $0x90] sm:$0xff] }
  0x24   :  { %198 = vmatpush.bf16.msra.mxu0 %v954_v20  ;;  %v312_v44 = vunpack.c.l.b16 %v96_v35  ;;  %v313_v45 = vunpack.c.l.b16 %v97_v36  ;;  %v98_v58 = vpack.c.bf16 %v94_v52, %v94_v52  ;;  %v99_v59 = vpack.c.bf16 %v95_v53, %v95_v53  ;;  %513 = vmatpush.bf16.msra.mxu3 %v980_v6  ;;  %v989_v18 = vld [vmem:[#allocation9 + $0xa8] sm:$0xff]  ;;  %v972_v20 = vld [vmem:[#allocation9 + $0x20] sm:$0xff] }
  0x25   :  { %277 = vmatpush.bf16.msra.mxu1 %v946_v21  ;;  %v220_v48 = vpack.c.b16 %v217_v41, %v216_v40  ;;  %v218_v62 = vunpack.c.l.b16 %v86_v56  ;;  %v219_v63 = vunpack.c.l.b16 %v87_v57  ;;  %v977_v19 = vld [vmem:[#allocation9 + $0x48] sm:$0xff]  ;;  %v988_v21 = vld [vmem:[#allocation9 + $0xa0] sm:$0xff] }
  0x26   :  { %373 = vmatpush.bf16.msra.mxu2 %v962_v25  ;;  %v316_v49 = vpack.c.b16 %v313_v45, %v312_v44  ;;  %v314_v0 = vunpack.c.l.b16 %v98_v58  ;;  %v315_v1 = vunpack.c.l.b16 %v99_v59  ;;  %v970_v25 = vld [vmem:[#allocation9 + $0x10] sm:$0xff]  ;;  %v969_v27 = vld [vmem:[#allocation9 + $0x8] sm:$0xff] }
  0x27   :  { %v221_v3 = vpack.c.b16 %v219_v63, %v218_v62 }
  0x28   :  { %199 = vmatpush.bf16.msra.mxu0 %v953_v33  ;;  %v317_v4 = vpack.c.b16 %v315_v1, %v314_v0  ;;  %514 = vmatpush.bf16.msra.mxu3 %v979_v9 }
  0x29   :  { %278 = vmatpush.bf16.msra.mxu1 %v945_v34  ;;  %v1017_v34 = vld [vmem:[%s1210_s2] ss:$0 sm:$0xff] }
  0x2a   :  { %374 = vmatpush.bf16.msra.mxu2 %v961_v37 }
  0x2c   :  { %200 = vmatpush.bf16.msra.mxu0 %v952_v42  ;;  %515 = vmatpush.bf16.msra.mxu3 %v978_v16 }
  0x2d   :  { %279 = vmatpush.bf16.msra.mxu1 %v944_v43 }
  0x2e   :  { %375 = vmatpush.bf16.msra.mxu2 %v960_v46 }
  0x2f   :  { %201 = vmatmul.bf16.vlgmr.msra.gmra.mxu0 %v141_v47 }
  0x30   :  { %280 = vmatmul.bf16.vlgmr.msra.gmra.mxu1 %v220_v48  ;;  %589 = vmatpush.bf16.msrb.mxu0 %v975_v7 }
  0x31   :  { %376 = vmatmul.bf16.vlgmr.msra.gmra.mxu2 %v316_v49  ;;  %685 = vmatpush.bf16.msrb.mxu1 %v991_v8 }
  0x32   :  { %992 = vmatpush.bf16.msrb.mxu2 %v975_v7  ;;  %516 = vmatpush.bf16.msra.mxu3 %v977_v19 }
  0x34   :  { %590 = vmatpush.bf16.msrb.mxu0 %v974_v14 }
  0x35   :  { %686 = vmatpush.bf16.msrb.mxu1 %v990_v15 }
  0x36   :  { %993 = vmatpush.bf16.msrb.mxu2 %v974_v14  ;;  %517 = vmatpush.bf16.msra.mxu3 %v976_v22 }
  0x38   :  { %591 = vmatpush.bf16.msrb.mxu0 %v973_v17 }
  0x39   :  { %687 = vmatpush.bf16.msrb.mxu1 %v989_v18 }
  0x3a   :  { %994 = vmatpush.bf16.msrb.mxu2 %v973_v17  ;;  %1000 = vmatpush.bf16.msrb.mxu3 %v991_v8 }
  0x3c   :  { %592 = vmatpush.bf16.msrb.mxu0 %v972_v20 }
  0x3d   :  { %688 = vmatpush.bf16.msrb.mxu1 %v988_v21 }
  0x3e   :  { %995 = vmatpush.bf16.msrb.mxu2 %v972_v20  ;;  %1001 = vmatpush.bf16.msrb.mxu3 %v990_v15 }
  0x3f   :  { %206 = vmatmul.bf16.gmra.mxu0 %v142_v2 }
  0x40   :  { %285 = vmatmul.bf16.gmra.mxu1 %v221_v3  ;;  %593 = vmatpush.bf16.msrb.mxu0 %v971_v23 }
  0x41   :  { %381 = vmatmul.bf16.gmra.mxu2 %v317_v4  ;;  %689 = vmatpush.bf16.msrb.mxu1 %v987_v24 }
  0x42   :  { %996 = vmatpush.bf16.msrb.mxu2 %v971_v23  ;;  %1002 = vmatpush.bf16.msrb.mxu3 %v989_v18 }
  0x44   :  { %594 = vmatpush.bf16.msrb.mxu0 %v970_v25 }
  0x45   :  { %690 = vmatpush.bf16.msrb.mxu1 %v986_v26 }
  0x46   :  { %997 = vmatpush.bf16.msrb.mxu2 %v970_v25  ;;  %1003 = vmatpush.bf16.msrb.mxu3 %v988_v21 }
  0x48   :  { %595 = vmatpush.bf16.msrb.mxu0 %v969_v27 }
  0x49   :  { %691 = vmatpush.bf16.msrb.mxu1 %v985_v28 }
  0x4a   :  { %998 = vmatpush.bf16.msrb.mxu2 %v969_v27  ;;  %1004 = vmatpush.bf16.msrb.mxu3 %v987_v24 }
  0x4c   :  { %596 = vmatpush.bf16.msrb.mxu0 %v968_v29 }
  0x4d   :  { %692 = vmatpush.bf16.msrb.mxu1 %v984_v30 }
  0x4e   :  { %999 = vmatpush.bf16.msrb.mxu2 %v968_v29  ;;  %1005 = vmatpush.bf16.msrb.mxu3 %v986_v26 }
  0x52   :  { %1006 = vmatpush.bf16.msrb.mxu3 %v985_v28 }
  0x56   :  { %1007 = vmatpush.bf16.msrb.mxu3 %v984_v30 }
  0xac   :  { %v202_v31 = vpop.f32.mrf.mxu0 }
  0xad   :  { %v281_v32 = vpop.f32.mrf.mxu1 }
  0xae   :  { %v282_v33 = vadd.f32 %v281_v32, %v202_v31 }
  0xb4   :  { %v377_v35 = vpop.f32.mrf.mxu2  ;;  %v204_v37 = vpop.f32.mrf.mxu0 }
  0xb5   :  { %v387_v36 = vadd.f32 %v377_v35, %v282_v33  ;;  %v283_v38 = vpop.f32.mrf.mxu1 }
  0xb6   :  { %v284_v41 = vadd.f32 %v283_v38, %v204_v37 }
  0xb7   :  { %v395_v39 = vadd.f32 %v1017_v34, %v387_v36 }
  0xb9   :  { %v399_v40 = vmax.f32 %v395_v39, 0.0 }
  0xbb   :  { %407 = vst [vmem:[#allocation3 + $0x1] sm:$0xff] %v399_v40 }
  0xbc   :  { %v379_v42 = vpop.f32.mrf.mxu2  ;;  %v207_v44 = vpop.f32.mrf.mxu0 }
  0xbd   :  { %v388_v43 = vadd.f32 %v379_v42, %v284_v41  ;;  %v286_v45 = vpop.f32.mrf.mxu1 }
  0xbe   :  { %v287_v48 = vadd.f32 %v286_v45, %v207_v44 }
  0xbf   :  { %v396_v46 = vadd.f32 %v1017_v34, %v388_v43 }
  0xc1   :  { %v400_v47 = vmax.f32 %v396_v46, 0.0 }
  0xc2   :  { %v411_v52 = vld [vmem:[#allocation3] sm:$0xff] }
  0xc3   :  { %408 = vst [vmem:[#allocation3 + $0x9] sm:$0xff] %v400_v47  ;;  %v419_v49 = vpack.c.bf16 %v400_v47, %v399_v40  ;;  %v415_v56 = vpack.c.bf16 %v411_v52, %v411_v52 }
  0xc4   :  { %v382_v50 = vpop.f32.mrf.mxu2  ;;  %v209_v54 = vpop.f32.mrf.mxu0 }
  0xc5   :  { %v389_v51 = vadd.f32 %v382_v50, %v287_v48  ;;  %518 = vmatmul.bf16.vlgmr.msra.gmra.mxu3 %v419_v49  ;;  %v288_v55 = vpop.f32.mrf.mxu1  ;;  %v533_v2 = vunpack.c.l.b16 %v415_v56 }
  0xc6   :  { %v289_v61 = vadd.f32 %v288_v55, %v209_v54 }
  0xc7   :  { %v397_v53 = vadd.f32 %v1017_v34, %v389_v51 }
  0xc9   :  { %v401_v57 = vmax.f32 %v397_v53, 0.0 }
  0xca   :  { %v412_v58 = vld [vmem:[#allocation3 + $0x8] sm:$0xff] }
  0xcb   :  { %v421_v59 = vld [vmem:[#allocation3 + $0x2] sm:$0xff]  ;;  %v422_v60 = vld [vmem:[#allocation3 + $0xa] sm:$0xff]  ;;  %409 = vst [vmem:[#allocation3 + $0x19] sm:$0xff] %v401_v57  ;;  %v416_v62 = vpack.c.bf16 %v412_v58, %v412_v58 }
  0xcc   :  { %v425_v63 = vpack.c.bf16 %v421_v59, %v421_v59  ;;  %v426_v0 = vpack.c.bf16 %v422_v60, %v422_v60  ;;  %v384_v1 = vpop.f32.mrf.mxu2 }
  0xcd   :  { %v390_v3 = vadd.f32 %v384_v1, %v289_v61  ;;  %v534_v4 = vunpack.c.l.b16 %v416_v62 }
  0xce   :  { %v629_v5 = vunpack.c.l.b16 %v425_v63  ;;  %v630_v6 = vunpack.c.l.b16 %v426_v0 }
  0xcf   :  { %v398_v7 = vadd.f32 %v1017_v34, %v390_v3  ;;  %v537_v8 = vpack.c.b16 %v534_v4, %v533_v2  ;;  %v1018_v34 = vld [vmem:[%s1212_s4] ss:$0 sm:$0xff]  ;;  %s1129_s4 = smov [#allocation10]  }
  0xd0   :  { %v633_v9 = vpack.c.b16 %v630_v6, %v629_v5  ;;  %s736_s12 = sshll.u32 %s1129_s4, 4  ;;  %s737_s12 = int_to_ptr.vmem [resolvable:$true] %s736_s12 }
  0xd1   :  { %v402_v14 = vmax.f32 %v398_v7, 0.0  ;;  %597 = vmatmul.bf16.vlgmr.msrb.gmra.mxu0 %v537_v8 }
  0xd2   :  { %693 = vmatmul.bf16.vlgmr.msrb.gmra.mxu1 %v633_v9  ;;  %v413_v16 = vld [vmem:[#allocation3 + $0x18] sm:$0xff] }
  0xd3   :  { %410 = vst [vmem:[#allocation3 + $0x21] sm:$0xff] %v402_v14  ;;  %v420_v15 = vpack.c.bf16 %v402_v14, %v401_v57  ;;  %v417_v17 = vpack.c.bf16 %v413_v16, %v413_v16 }
  0xd5   :  { %523 = vmatmul.bf16.gmra.mxu3 %v420_v15  ;;  %v535_v24 = vunpack.c.l.b16 %v417_v17 }
  0xda   :  { %v414_v18 = vld [vmem:[#allocation3 + $0x20] sm:$0xff] }
  0xdb   :  { %v423_v19 = vld [vmem:[#allocation3 + $0x1a] sm:$0xff]  ;;  %v424_v20 = vld [vmem:[#allocation3 + $0x22] sm:$0xff]  ;;  %v418_v21 = vpack.c.bf16 %v414_v18, %v414_v18 }
  0xdc   :  { %v427_v22 = vpack.c.bf16 %v423_v19, %v423_v19  ;;  %v428_v23 = vpack.c.bf16 %v424_v20, %v424_v20 }
  0xdd   :  { %v536_v25 = vunpack.c.l.b16 %v418_v21 }
  0xde   :  { %v631_v27 = vunpack.c.l.b16 %v427_v22  ;;  %v632_v28 = vunpack.c.l.b16 %v428_v23 }
  0xdf   :  { %v538_v26 = vpack.c.b16 %v536_v25, %v535_v24 }
  0xe0   :  { %v634_v29 = vpack.c.b16 %v632_v28, %v631_v27 }
  0xe1   :  { %602 = vmatmul.bf16.vlgmr.msrb.gmra.mxu2 %v538_v26 }
  0xe5   :  { %698 = vmatmul.bf16.vlgmr.msrb.gmra.mxu3 %v634_v29 }
 0x148   :  { %v519_v30 = vpop.f32.mrf.mxu3 }
 0x14e   :  { %v598_v31 = vpop.f32.mrf.mxu0 }
 0x14f   :  { %v694_v32 = vpop.f32.mrf.mxu1  ;;  %v599_v33 = vadd.f32 %v598_v31, %v519_v30 }
 0x150   :  { %v521_v35 = vpop.f32.mrf.mxu3 }
 0x151   :  { %v704_v36 = vadd.f32 %v694_v32, %v599_v33 }
 0x153   :  { %v716_v37 = vadd.f32 %v1018_v34, %v704_v36 }
 0x155   :  { %v720_v38 = vadd.f32 %v716_v37, %v1172_v10 }
 0x156   :  { %v600_v39 = vpop.f32.mrf.mxu0 }
 0x157   :  { %v724_v40 = vmax.f32 %v720_v38, 0.0  ;;  %v601_v41 = vadd.f32 %v600_v39, %v521_v35  ;;  %v696_v42 = vpop.f32.mrf.mxu1 }
 0x158   :  { %v524_v43 = vpop.f32.mrf.mxu3 }
 0x159   :  { %728 = vst [vmem:[#allocation10] sm:$0xff] %v724_v40  ;;  %v705_v44 = vadd.f32 %v696_v42, %v601_v41 }
 0x15b   :  { %v717_v45 = vadd.f32 %v1018_v34, %v705_v44 }
 0x15d   :  { %v721_v46 = vadd.f32 %v717_v45, %v1174_v11 }
 0x15f   :  { %v725_v47 = vmax.f32 %v721_v46, 0.0 }
 0x160   :  { %v526_v48 = vpop.f32.mrf.mxu3 }
 0x161   :  { %729 = vst [vmem:[#allocation10 + $0x8] sm:$0xff] %v725_v47 }
 0x164   :  { %v603_v49 = vpop.f32.mrf.mxu2 }
 0x165   :  { %v604_v50 = vadd.f32 %v603_v49, %v524_v43 }
 0x168   :  { %v699_v51 = vpop.f32.mrf.mxu3 }
 0x169   :  { %v706_v52 = vadd.f32 %v699_v51, %v604_v50 }
 0x16b   :  { %v718_v53 = vadd.f32 %v1018_v34, %v706_v52 }
 0x16c   :  { %v605_v54 = vpop.f32.mrf.mxu2 }
 0x16d   :  { %v722_v10 = vadd.f32 %v718_v53, %v1176_v12  ;;  %v606_v56 = vadd.f32 %v605_v54, %v526_v48 }
 0x16f   :  { %v726_v55 = vmax.f32 %v722_v10, 0.0 }
 0x170   :  { %v701_v57 = vpop.f32.mrf.mxu3 }
 0x171   :  { %730 = vst [vmem:[#allocation10 + $0x10] sm:$0xff] %v726_v55  ;;  %v707_v58 = vadd.f32 %v701_v57, %v606_v56 }
 0x173   :  { %v719_v59 = vadd.f32 %v1018_v34, %v707_v58 }
 0x175   :  { %v723_v11 = vadd.f32 %v719_v59, %v1179_v13 }
 0x177   :  { %v727_v60 = vmax.f32 %v723_v11, 0.0 }
 0x179   :  { %731 = vst [vmem:[#allocation10 + $0x18] sm:$0xff] %v727_v60 }
 0x17a   :  { %744 = dma.vmem_to_hbm [thread:$0]  %s737_s12, 512, %s739_s15, [#allocation6], %s1125_s30, %s1125_s30, %s1126_s6  }
 0x17b   :  { %1119 = dma.done.wait [#allocation6], 512  }
 0x17c   :  { %1120 = vsyncadd [#allocation6], 4294966784 }
 0x17d   :  { %749 = vsyncpa [#allocation5], 1 }
 0x17e   :  { %750 = vsyncpa [#allocation8], 1 }
 0x17f   :  { %751 = vsyncpa [#allocation6], 1 }

</bundles_post_ra>
